<compile_context>
chip_gen: v7x
topology: tpu7x:2x2x1
jax: 0.10.0
libtpu: 0.0.40
codegen_flags: <defaults>
</compile_context>

<pallas_src>
import math

import jax
import jax.numpy as jnp
from jax import lax
from jax.experimental import pallas as pl
from jax.experimental.pallas import tpu as pltpu

# ----- model hyper-parameters (mirroring the PyTorch module) -----------------
EMBEDDING_SIZE = 5              # embedding_size
NUM_EMBEDDINGS = 20             # nn.Embedding(num_embeddings=20, ...)
KERNEL_SIZES = (2, 3, 4)        # kernel_size
NUM_CLASSES = 2                 # num_classes
OUTPUT_CHANNEL = 2              # output_channel
SEQ_LEN = 8                     # in_channel = len(input_batch[0])
BATCH = 2

NUM_GROUPS = OUTPUT_CHANNEL * len(KERNEL_SIZES)              # 6 pooled features
FC_IN = NUM_GROUPS + 1                                       # 7
W_MAX = max(EMBEDDING_SIZE - h + 1 for h in KERNEL_SIZES)    # 4 window slots
NCOL = NUM_GROUPS * W_MAX                                    # 24 conv columns
SV = SEQ_LEN * NUM_EMBEDDINGS                                # 160 one-hot width

_HI = lax.Precision.HIGHEST


# ----- Pallas kernel ----------------------------------------------------------
def textcnn_kernel(ids_ref, prob_ref, sel_ref, conv_ref, fc_ref, out_ref):
    S, V, G = SEQ_LEN, NUM_EMBEDDINGS, NUM_GROUPS

    # --- one-hot token encoding for the whole batch tile (no gather) ---------
    ids_f = ids_ref[...].astype(jnp.float32)                 # (TB, S)
    rep = sel_ref[0:S, :]                                    # (S, S*V), rep[c, c*V+v]=1
    vpos = sel_ref[S:S + 1, :]                               # (1, S*V), j % V
    # ids_rep[b, j] = ids[b, j // V]; exact for integer ids in any precision.
    ids_rep = jnp.dot(ids_f, rep,
                      preferred_element_type=jnp.float32)    # (TB, S*V)
    onehot = (ids_rep == vpos).astype(jnp.float32)           # (TB, S*V)

    # --- embedding + all Conv1d branches fused into a single MXU matmul ------
    big_w = conv_ref[0:SV, :]                                # (S*V, NCOL)
    big_b = conv_ref[SV:SV + 1, :]                           # (1, NCOL)
    conv = jnp.dot(onehot, big_w, precision=_HI,
                   preferred_element_type=jnp.float32) + big_b
    conv = jnp.maximum(conv, 0.0)                            # ReLU, (TB, NCOL)

    # --- MaxPool1d over window positions (columns are window-major) ----------
    pooled = conv[:, 0:G]
    for w in range(1, W_MAX):                                # static unroll (3 maxes)
        pooled = jnp.maximum(pooled, conv[:, w * G:(w + 1) * G])   # (TB, G)

    # --- fused FC epilogue: one dot + prob feature + bias ---------------------
    wfc = fc_ref[0:G, :]                                     # (G, C)
    wprob = fc_ref[G:G + 1, :]                               # (1, C)
    bfc = fc_ref[G + 1:G + 2, :]                             # (1, C)
    out_ref[...] = (jnp.dot(pooled, wfc, precision=_HI,
                            preferred_element_type=jnp.float32)
                    + prob_ref[...] * wprob + bfc)           # (TB, C)


# ----- parameter packing (pure layout/linear-algebra prep, done once) ---------
def _pack_params(params):
    V, E, S, O = NUM_EMBEDDINGS, EMBEDDING_SIZE, SEQ_LEN, OUTPUT_CHANNEL

    # selection constants for the in-kernel one-hot
    rep = (jnp.arange(SV)[None, :] // V == jnp.arange(S)[:, None]).astype(jnp.float32)
    vpos = (jnp.arange(SV) % V).astype(jnp.float32)[None, :]
    sel = jnp.concatenate([rep, vpos], axis=0)               # (S+1, S*V)

    # fused embedding+conv weight: big_w[c*V+v, w*G+g] = sum_k emb[v,w+k]*W_h[o,c,k]
    emb = params["emb"].astype(jnp.float32)                  # (V, E)
    big_w = jnp.zeros((SV, W_MAX, NUM_GROUPS), jnp.float32)
    big_b = jnp.zeros((W_MAX, NUM_GROUPS), jnp.float32)
    for br_idx, h in enumerate(KERNEL_SIZES):
        wh = E - h + 1                                       # conv output width
        w_conv = params[f"conv{h}_w"].astype(jnp.float32)    # (O, S, h)
        b_conv = params[f"conv{h}_b"].astype(jnp.float32)    # (O,)
        emb_win = jnp.stack([emb[:, w:w + h] for w in range(wh)], axis=0)  # (wh, V, h)
        contrib = jnp.einsum("wvk,ock->cvwo", emb_win, w_conv,
                             precision=_HI)                  # (S, V, wh, O)
        big_w = big_w.at[:, 0:wh, br_idx * O:(br_idx + 1) * O].set(
            contrib.reshape(SV, wh, O))
        big_b = big_b.at[0:wh, br_idx * O:(br_idx + 1) * O].set(
            jnp.broadcast_to(b_conv, (wh, O)))
    conv_pack = jnp.concatenate(
        [big_w.reshape(SV, NCOL), big_b.reshape(1, NCOL)], axis=0)   # (S*V+1, NCOL)

    fc_pack = jnp.concatenate(
        [params["fc_w"].T.astype(jnp.float32),
         params["fc_b"].reshape(1, NUM_CLASSES).astype(jnp.float32)],
        axis=0)                                              # (FC_IN+1, C)
    return sel, conv_pack, fc_pack


# ----- wrapper ----------------------------------------------------------------
def textcnn_forward(x_ids, x_prob, params, *, tile_b=None):
    B = x_ids.shape[0]
    if tile_b is None:
        tile_b = min(512, pl.cdiv(B, 8) * 8)   # sublane-aligned batch tile; fits VMEM
    b_pad = pl.cdiv(B, tile_b) * tile_b
    n_tiles = b_pad // tile_b

    ids_p = jnp.zeros((b_pad, SEQ_LEN), jnp.int32).at[:B].set(x_ids.astype(jnp.int32))
    prob_p = jnp.zeros((b_pad, 1), jnp.float32).at[:B].set(
        x_prob.reshape(B, 1).astype(jnp.float32))

    sel, conv_pack, fc_pack = _pack_params(params)

    out = pl.pallas_call(
        textcnn_kernel,
        out_shape=jax.ShapeDtypeStruct((b_pad, NUM_CLASSES), jnp.float32),
        grid=(n_tiles,),
        in_specs=[
            pl.BlockSpec((tile_b, SEQ_LEN), lambda i: (i, 0)),           # token ids
            pl.BlockSpec((tile_b, 1), lambda i: (i, 0)),                 # x_prob
            pl.BlockSpec((SEQ_LEN + 1, SV), lambda i: (0, 0)),           # one-hot consts
            pl.BlockSpec((SV + 1, NCOL), lambda i: (0, 0)),              # fused conv W+b
            pl.BlockSpec((FC_IN + 1, NUM_CLASSES), lambda i: (0, 0)),    # fc W+b
        ],
        out_specs=pl.BlockSpec((tile_b, NUM_CLASSES), lambda i: (i, 0)),
        compiler_params=pltpu.CompilerParams(dimension_semantics=("parallel",)),
    )(ids_p, prob_p, sel, conv_pack, fc_pack)
    return out[:B]


# ----- pure-JAX reference (independent of the kernel formulation) -------------
def textcnn_reference(x_ids, x_prob, params):
    xe = params["emb"][x_ids]                                # (B, S, E)
    feats = []
    for h in KERNEL_SIZES:
        w = params[f"conv{h}_w"]                             # (O, S, h)
        b = params[f"conv{h}_b"]                             # (O,)
        cols = []
        for p in range(EMBEDDING_SIZE - h + 1):
            win = xe[:, :, p:p + h]                          # (B, S, h)
            cols.append(jnp.einsum("bck,ock->bo", win, w, precision=_HI) + b)
        conv = jnp.maximum(jnp.stack(cols, axis=-1), 0.0)    # (B, O, W_h)
        feats.append(jnp.max(conv, axis=-1))                 # (B, O)
    feats.append(x_prob.reshape(-1, 1))
    flat = jnp.concatenate(feats, axis=1)                    # (B, 7)
    return jnp.dot(flat, params["fc_w"].T, precision=_HI) + params["fc_b"]


# ----- deterministic parameter init (torch-like shapes) -----------------------
def init_params(key):
    ks = jax.random.split(key, 10)
    params = {"emb": jax.random.normal(ks[0], (NUM_EMBEDDINGS, EMBEDDING_SIZE),
                                       jnp.float32)}
    i = 1
    for h in KERNEL_SIZES:
        bound = 1.0 / math.sqrt(SEQ_LEN * h)
        params[f"conv{h}_w"] = jax.random.uniform(
            ks[i], (OUTPUT_CHANNEL, SEQ_LEN, h), jnp.float32, -bound, bound)
        params[f"conv{h}_b"] = jax.random.uniform(
            ks[i + 1], (OUTPUT_CHANNEL,), jnp.float32, -bound, bound)
        i += 2
    bound = 1.0 / math.sqrt(FC_IN)
    params["fc_w"] = jax.random.uniform(ks[i], (NUM_CLASSES, FC_IN),
                                        jnp.float32, -bound, bound)
    params["fc_b"] = jax.random.uniform(ks[i + 1], (NUM_CLASSES,),
                                        jnp.float32, -bound, bound)
    return params


if __name__ == "__main__":
    key = jax.random.PRNGKey(0)
    kp, kx, kq = jax.random.split(key, 3)
    params = init_params(kp)
    x_ids = jax.random.randint(kx, (BATCH, SEQ_LEN), 0, NUM_EMBEDDINGS, jnp.int32)
    x_prob = jax.random.uniform(kq, (BATCH, 1, 1), jnp.float32)

    out = jax.block_until_ready(textcnn_forward(x_ids, x_prob, params))
    ref = textcnn_reference(x_ids, x_prob, params)

    assert out.shape == (BATCH, NUM_CLASSES), out.shape
    # MXU fp32 contract precision: tolerance covers any backend rounding mode.
    assert jnp.allclose(out, ref, atol=2e-3, rtol=2e-3), (out, ref)
    print("KERNEL_OK")
</pallas_src>

<mosaic_0001>
module attributes {stable_mosaic.version = 11 : i64} {
  func.func @textcnn_kernel(%arg0: i32, %arg1: memref<8x8xi32, #tpu.memory_space<vmem>>, %arg2: memref<8x1xf32, #tpu.memory_space<vmem>>, %arg3: memref<9x160xf32, #tpu.memory_space<vmem>>, %arg4: memref<161x24xf32, #tpu.memory_space<vmem>>, %arg5: memref<8x2xf32, #tpu.memory_space<vmem>>, %arg6: memref<8x2xf32, #tpu.memory_space<vmem>>) attributes {dimension_semantics = [#tpu.dimension_semantics<parallel>], iteration_bounds = array<i64: 1>, scalar_prefetch = 0 : i64, scratch_operands = 0 : i64, tpu.core_type = #tpu.core_type<tc>, window_params = [{transform_indices = @transform_0, window_bounds = array<i64: 8, 8>}, {transform_indices = @transform_1, window_bounds = array<i64: 8, 1>}, {pipeline_mode = #tpu.pipeline_mode<synchronous>, transform_indices = @transform_2, window_bounds = array<i64: 9, 160>}, {pipeline_mode = #tpu.pipeline_mode<synchronous>, transform_indices = @transform_3, window_bounds = array<i64: 161, 24>}, {pipeline_mode = #tpu.pipeline_mode<synchronous>, transform_indices = @transform_4, window_bounds = array<i64: 8, 2>}, {transform_indices = @transform_5, window_bounds = array<i64: 8, 2>}]} {
    %c0 = arith.constant 0 : index
    %c0_0 = arith.constant 0 : index
    %0 = vector.load %arg1[%c0, %c0_0] : memref<8x8xi32, #tpu.memory_space<vmem>>, vector<8x8xi32>
    %1 = arith.sitofp %0 : vector<8x8xi32> to vector<8x8xf32>
    %c0_1 = arith.constant 0 : index
    %c0_2 = arith.constant 0 : index
    %2 = vector.load %arg3[%c0_1, %c0_2] : memref<9x160xf32, #tpu.memory_space<vmem>>, vector<8x160xf32>
    %c8 = arith.constant 8 : index
    %c0_3 = arith.constant 0 : index
    %3 = vector.load %arg3[%c8, %c0_3] : memref<9x160xf32, #tpu.memory_space<vmem>>, vector<1x160xf32>
    %cst = arith.constant dense<0.000000e+00> : vector<8x160xf32>
    %4 = tpu.matmul %1, %2, %cst {dimension_numbers = #tpu.dot_dimension_numbers<[1], [0], [0], [1], [0, 0, 1, 1], [], []>} : vector<8x8xf32>, vector<8x160xf32>, vector<8x160xf32> -> vector<8x160xf32>
    %5 = vector.broadcast %3 : vector<1x160xf32> to vector<8x160xf32>
    %6 = arith.cmpf oeq, %4, %5 : vector<8x160xf32>
    %7 = arith.extui %6 : vector<8x160xi1> to vector<8x160xi32>
    %8 = arith.sitofp %7 : vector<8x160xi32> to vector<8x160xf32>
    %c0_4 = arith.constant 0 : index
    %c0_5 = arith.constant 0 : index
    %9 = vector.load %arg4[%c0_4, %c0_5] : memref<161x24xf32, #tpu.memory_space<vmem>>, vector<160x24xf32>
    %c160 = arith.constant 160 : index
    %c0_6 = arith.constant 0 : index
    %10 = vector.load %arg4[%c160, %c0_6] : memref<161x24xf32, #tpu.memory_space<vmem>>, vector<1x24xf32>
    %cst_7 = arith.constant dense<0.000000e+00> : vector<8x24xf32>
    %11 = tpu.matmul %8, %9, %cst_7 {dimension_numbers = #tpu.dot_dimension_numbers<[1], [0], [0], [1], [0, 0, 1, 1], [], []>, precision = #tpu.contract_precision<fp32>} : vector<8x160xf32>, vector<160x24xf32>, vector<8x24xf32> -> vector<8x24xf32>
    %12 = vector.broadcast %10 : vector<1x24xf32> to vector<8x24xf32>
    %13 = arith.addf %11, %12 : vector<8x24xf32>
    %cst_8 = arith.constant 0.000000e+00 : f32
    %14 = vector.broadcast %cst_8 : f32 to vector<8x24xf32>
    %15 = arith.maximumf %13, %14 : vector<8x24xf32>
    %16 = vector.extract_strided_slice %15 {offsets = [0, 0], sizes = [8, 6], strides = [1, 1]} : vector<8x24xf32> to vector<8x6xf32>
    %17 = vector.extract_strided_slice %15 {offsets = [0, 6], sizes = [8, 6], strides = [1, 1]} : vector<8x24xf32> to vector<8x6xf32>
    %18 = arith.maximumf %16, %17 : vector<8x6xf32>
    %19 = vector.extract_strided_slice %15 {offsets = [0, 12], sizes = [8, 6], strides = [1, 1]} : vector<8x24xf32> to vector<8x6xf32>
    %20 = arith.maximumf %18, %19 : vector<8x6xf32>
    %21 = vector.extract_strided_slice %15 {offsets = [0, 18], sizes = [8, 6], strides = [1, 1]} : vector<8x24xf32> to vector<8x6xf32>
    %22 = arith.maximumf %20, %21 : vector<8x6xf32>
    %c0_9 = arith.constant 0 : index
    %c0_10 = arith.constant 0 : index
    %23 = vector.load %arg5[%c0_9, %c0_10] : memref<8x2xf32, #tpu.memory_space<vmem>>, vector<6x2xf32>
    %c6 = arith.constant 6 : index
    %c0_11 = arith.constant 0 : index
    %24 = vector.load %arg5[%c6, %c0_11] : memref<8x2xf32, #tpu.memory_space<vmem>>, vector<1x2xf32>
    %c7 = arith.constant 7 : index
    %c0_12 = arith.constant 0 : index
    %25 = vector.load %arg5[%c7, %c0_12] : memref<8x2xf32, #tpu.memory_space<vmem>>, vector<1x2xf32>
    %cst_13 = arith.constant dense<0.000000e+00> : vector<8x2xf32>
    %26 = tpu.matmul %22, %23, %cst_13 {dimension_numbers = #tpu.dot_dimension_numbers<[1], [0], [0], [1], [0, 0, 1, 1], [], []>, precision = #tpu.contract_precision<fp32>} : vector<8x6xf32>, vector<6x2xf32>, vector<8x2xf32> -> vector<8x2xf32>
    %c0_14 = arith.constant 0 : index
    %c0_15 = arith.constant 0 : index
    %27 = vector.load %arg2[%c0_14, %c0_15] : memref<8x1xf32, #tpu.memory_space<vmem>>, vector<8x1xf32>
    %28 = vector.broadcast %27 : vector<8x1xf32> to vector<8x2xf32>
    %29 = vector.broadcast %24 : vector<1x2xf32> to vector<8x2xf32>
    %30 = arith.mulf %28, %29 : vector<8x2xf32>
    %31 = arith.addf %26, %30 : vector<8x2xf32>
    %32 = vector.broadcast %25 : vector<1x2xf32> to vector<8x2xf32>
    %33 = arith.addf %31, %32 : vector<8x2xf32>
    %c0_16 = arith.constant 0 : index
    %c0_17 = arith.constant 0 : index
    %34 = vector.load %arg6[%c0_16, %c0_17] : memref<8x2xf32, #tpu.memory_space<vmem>>, vector<8x2xf32>
    tpu.vector_store %arg6[%c0_16, %c0_17], %33 {strides = array<i32>} : memref<8x2xf32, #tpu.memory_space<vmem>>, vector<8x2xf32>,
    return
  }
  func.func @transform_0(%arg0: i32) -> (i32, i32) {
    %c0_i32 = arith.constant 0 : i32
    %c0_i32_0 = arith.constant 0 : i32
    return %arg0, %c0_i32 : i32, i32
  }
  func.func @transform_1(%arg0: i32) -> (i32, i32) {
    %c0_i32 = arith.constant 0 : i32
    %c0_i32_0 = arith.constant 0 : i32
    return %arg0, %c0_i32 : i32, i32
  }
  func.func @transform_2(%arg0: i32) -> (i32, i32) {
    %c0_i32 = arith.constant 0 : i32
    %c0_i32_0 = arith.constant 0 : i32
    %c0_i32_1 = arith.constant 0 : i32
    return %c0_i32, %c0_i32_0 : i32, i32
  }
  func.func @transform_3(%arg0: i32) -> (i32, i32) {
    %c0_i32 = arith.constant 0 : i32
    %c0_i32_0 = arith.constant 0 : i32
    %c0_i32_1 = arith.constant 0 : i32
    return %c0_i32, %c0_i32_0 : i32, i32
  }
  func.func @transform_4(%arg0: i32) -> (i32, i32) {
    %c0_i32 = arith.constant 0 : i32
    %c0_i32_0 = arith.constant 0 : i32
    %c0_i32_1 = arith.constant 0 : i32
    return %c0_i32, %c0_i32_0 : i32, i32
  }
  func.func @transform_5(%arg0: i32) -> (i32, i32) {
    %c0_i32 = arith.constant 0 : i32
    %c0_i32_0 = arith.constant 0 : i32
    return %arg0, %c0_i32 : i32, i32
  }
}

</mosaic_0001>

<bundles_post_ra>
// kernel: tpu_custom_call.1
= control target key start
LH: loop header
LB: loop body
LE: loop exit
PB: predicated region body
PF: predicated region fallthrough
CT: control target
= control target key end

     0   :  { %v1601_v2 = vmov 0.0   ;;  %vm26_vm0 = vcmask 64512   ;;  %v2083_v4 = vmov 0.0|0.0   ;;  %vm143_vm2 = vcmask 261120   ;;  %s1605_s17 = smov 110   ;;  %s1607_s18 = smov 116   ;;  %s2077_s2 = inlined_call_operand.vmem [shape: f32[9,160], index: 2, kind: input, shape index: {}]   ;;  %s2078_s0 = inlined_call_operand.vmem [shape: s32[8,8], index: 0, kind: input, shape index: {}]   ;;  %s2079_s3 = inlined_call_operand.vmem [shape: f32[161,24], index: 3, kind: input, shape index: {}]   ;;  %s2080_s4 = inlined_call_operand.vmem [shape: f32[8,2], index: 4, kind: input, shape index: {}]   ;;  %s2081_s1 = inlined_call_operand.vmem [shape: f32[8,1], index: 1, kind: input, shape index: {}]   ;;  %s2082_s5 = inlined_call_operand.vmem [shape: f32[8,2], index: 5, kind: output, shape index: {}]  }
   0x1   :  { %v23_v0 = vld [vmem:[%s2077_s2 + $0x8] sm:$0xff]  ;;  %v22_v1 = vld [vmem:[%s2077_s2] sm:$0xff]  ;;  %94 = vmatprep.mubr.f32.mxu0 %v1601_v2  ;;  %1491 = vmatprep.subr.bf16.mxu1 %v2083_v4  ;;  %v120_v8 = vld [vmem:[%s2079_s3 + $0x10] sm:$0xff]  ;;  %vm885_vm4 = vcmask 1045504   ;;  %vm1604_vm5 = vmmov 0   ;;  %vm881_vm6 = vcmask 48128  }
   0x2   :  { %v20_v3 = vld [vmem:[%s2078_s0] sm:$0xff]  ;;  %30 = vmatprep.subr.mxu0 %v23_v0  ;;  %v119_v7 = vld [vmem:[%s2079_s3 + $0x8] sm:$0xff]  ;;  %v121_v11 = vld [vmem:[%s2079_s3 + $0x18] sm:$0xff]  ;;  %v154_v12 = vand.u32 4294901760, %v120_v8  ;;  %vm1340_vm7 = vcmask 15360  }
   0x3   :  { %v21_v5 = vcvt.s32.f32 %v20_v3  ;;  %v118_v6 = vld [vmem:[%s2079_s3] sm:$0xff]  ;;  %31 = vmatpush1.msra.mxu0 %v22_v1  ;;  %v151_v10 = vand.u32 4294901760, %v119_v7  ;;  %v123_v14 = vld [vmem:[%s2079_s3 + $0x28] sm:$0xff]  ;;  %v157_v15 = vand.u32 4294901760, %v121_v11  ;;  %v124_v18 = vld [vmem:[%s2079_s3 + $0x30] sm:$0xff] }
   0x4   :  { %v148_v9 = vand.u32 4294901760, %v118_v6  ;;  %v122_v13 = vld [vmem:[%s2079_s3 + $0x20] sm:$0xff]  ;;  %1401 = vmatprep.subr.bf16.mxu0 %v2083_v4  ;;  %v163_v17 = vand.u32 4294901760, %v123_v14  ;;  %v125_v19 = vld [vmem:[%s2079_s3 + $0x38] sm:$0xff]  ;;  %v1684_v24 = vsub.f32 %v120_v8, %v154_v12  ;;  %v127_v25 = vld [vmem:[%s2079_s3 + $0x48] sm:$0xff]  ;;  %v166_v33 = vand.u32 4294901760, %v124_v18 }
   0x5   :  { %1347 = vmatmul.mubr.msk.f32.vlgmr.msra.gmra.mrb[0].mxu0 %vm26_vm0, %v21_v5  ;;  %v160_v16 = vand.u32 4294901760, %v122_v13  ;;  %v126_v20 = vld [vmem:[%s2079_s3 + $0x40] sm:$0xff]  ;;  %v1682_v23 = vsub.f32 %v119_v7, %v151_v10  ;;  %v128_v26 = vld [vmem:[%s2079_s3 + $0x50] sm:$0xff]  ;;  %v129_v27 = vld [vmem:[%s2079_s3 + $0x58] sm:$0xff]  ;;  %v1695_v28 = vpack.c.bf16 %v157_v15, %v154_v12  ;;  %v1697_v29 = vsub.f32 %v121_v11, %v157_v15 }
   0x6   :  { %v1678_v21 = vpack.c.bf16 %v151_v10, %v148_v9  ;;  %v1680_v22 = vsub.f32 %v118_v6, %v148_v9  ;;  %v130_v31 = vld [vmem:[%s2079_s3 + $0x60] sm:$0xff]  ;;  %v1706_v32 = vsub.f32 %v123_v14, %v163_v17  ;;  %v169_v34 = vand.u32 4294901760, %v125_v19  ;;  %v131_v39 = vld [vmem:[%s2079_s3 + $0x68] sm:$0xff]  ;;  %v132_v40 = vld [vmem:[%s2079_s3 + $0x70] sm:$0xff] }
   0x7   :  { %v1699_v30 = vsub.f32 %v122_v13, %v160_v16  ;;  %v172_v35 = vand.u32 4294901760, %v126_v20  ;;  %v175_v36 = vand.u32 4294901760, %v127_v25  ;;  %v178_v37 = vand.u32 4294901760, %v128_v26  ;;  %v133_v45 = vld [vmem:[%s2079_s3 + $0x78] sm:$0xff]  ;;  %v134_v62 = vld [vmem:[%s2079_s3 + $0x80] sm:$0xff]  ;;  %v135_v63 = vld [vmem:[%s2079_s3 + $0x88] sm:$0xff] }
   0x8   :  { %1493 = vmatpush1.bf16.msra.mxu1 %v1678_v21  ;;  %1403 = vmatpush1.bf16.msra.mxu0 %v1678_v21  ;;  %v181_v38 = vand.u32 4294901760, %v129_v27  ;;  %v1716_v41 = vsub.f32 %v124_v18, %v166_v33  ;;  %v1718_v42 = vsub.f32 %v125_v19, %v169_v34  ;;  %v184_v44 = vand.u32 4294901760, %v130_v31  ;;  %v136_v5 = vld [vmem:[%s2079_s3 + $0x90] sm:$0xff]  ;;  %v137_v6 = vld [vmem:[%s2079_s3 + $0x98] sm:$0xff] }
   0x9   :  { %1494 = vmatprep.subr.bf16.mxu1 %v2083_v4  ;;  %1404 = vmatprep.subr.bf16.mxu0 %v2083_v4  ;;  %v1720_v43 = vsub.f32 %v126_v20, %v172_v35  ;;  %v1725_v46 = vpack.c.bf16 %v163_v17, %v160_v16  ;;  %v1727_v47 = vsub.f32 %v127_v25, %v175_v36  ;;  %v187_v50 = vand.u32 4294901760, %v131_v39 }
   0xa   :  { %v1729_v48 = vsub.f32 %v128_v26, %v178_v37  ;;  %v1733_v49 = vsub.f32 %v129_v27, %v181_v38  ;;  %v1735_v51 = vsub.f32 %v130_v31, %v184_v44  ;;  %v190_v52 = vand.u32 4294901760, %v132_v40 }
   0xb   :  { %v193_v53 = vand.u32 4294901760, %v133_v45  ;;  %v1739_v54 = vsub.f32 %v131_v39, %v187_v50  ;;  %v1747_v57 = vpack.c.bf16 %v169_v34, %v166_v33  ;;  %v1753_v58 = vpack.c.bf16 %v175_v36, %v172_v35 }
   0xc   :  { %1496 = vmatpush1.bf16.msra.mxu1 %v1695_v28  ;;  %1406 = vmatpush1.bf16.msra.mxu0 %v1695_v28  ;;  %v1741_v55 = vsub.f32 %v132_v40, %v190_v52  ;;  %v1759_v59 = vpack.c.bf16 %v181_v38, %v178_v37  ;;  %v1765_v60 = vpack.c.bf16 %v187_v50, %v184_v44  ;;  %v196_v0 = vand.u32 4294901760, %v134_v62 }
   0xd   :  { %1497 = vmatprep.subr.bf16.mxu1 %v2083_v4  ;;  %1407 = vmatprep.subr.bf16.mxu0 %v2083_v4  ;;  %v1743_v56 = vsub.f32 %v133_v45, %v193_v53  ;;  %v1771_v61 = vpack.c.bf16 %v193_v53, %v190_v52  ;;  %v199_v1 = vand.u32 4294901760, %v135_v63  ;;  %v202_v7 = vand.u32 4294901760, %v136_v5 }
   0xe   :  { %v205_v8 = vand.u32 4294901760, %v137_v6  ;;  %v1799_v10 = vsub.f32 %v134_v62, %v196_v0  ;;  %v250_v14 = vand.u32 4294901760, %v1680_v22  ;;  %v257_v15 = vand.u32 4294901760, %v1682_v23 }
   0xf   :  { %v1785_v3 = vpack.c.bf16 %v199_v1, %v196_v0  ;;  %v1801_v11 = vsub.f32 %v135_v63, %v199_v1  ;;  %v1803_v12 = vsub.f32 %v136_v5, %v202_v7  ;;  %v264_v25 = vand.u32 4294901760, %v1684_v24 }
  0x10   :  { %1499 = vmatpush1.bf16.msra.mxu1 %v1725_v46  ;;  %1409 = vmatpush1.bf16.msra.mxu0 %v1725_v46  ;;  %v1797_v9 = vpack.c.bf16 %v205_v8, %v202_v7  ;;  %v1805_v13 = vsub.f32 %v137_v6, %v205_v8  ;;  %v1813_v16 = vpack.c.bf16 %v257_v15, %v250_v14  ;;  %v271_v26 = vand.u32 4294901760, %v1697_v29 }
  0x11   :  { %1500 = vmatprep.subr.bf16.mxu1 %v2083_v4  ;;  %1410 = vmatprep.subr.bf16.mxu0 %v2083_v4  ;;  %v251_v17 = vsub.f32 %v1680_v22, %v250_v14  ;;  %v258_v18 = vsub.f32 %v1682_v23, %v257_v15  ;;  %v265_v33 = vsub.f32 %v1684_v24, %v264_v25  ;;  %v278_v37 = vand.u32 4294901760, %v1699_v30 }
  0x12   :  { %v1821_v31 = vpack.c.bf16 %v271_v26, %v264_v25  ;;  %v272_v34 = vsub.f32 %v1697_v29, %v271_v26  ;;  %v285_v38 = vand.u32 4294901760, %v1706_v32  ;;  %v292_v53 = vand.u32 4294901760, %v1716_v41 }
  0x13   :  { %v252_v19 = vand.u32 4294901760, %v251_v17  ;;  %v259_v20 = vand.u32 4294901760, %v258_v18  ;;  %v266_v35 = vand.u32 4294901760, %v265_v33  ;;  %v279_v44 = vsub.f32 %v1699_v30, %v278_v37 }
  0x14   :  { %1502 = vmatpush1.bf16.msra.mxu1 %v1747_v57  ;;  %1412 = vmatpush1.bf16.msra.mxu0 %v1747_v57  ;;  %v273_v36 = vand.u32 4294901760, %v272_v34  ;;  %v1829_v40 = vpack.c.bf16 %v285_v38, %v278_v37  ;;  %v286_v45 = vsub.f32 %v1706_v32, %v285_v38  ;;  %v299_v62 = vand.u32 4294901760, %v1718_v42 }
  0x15   :  { %1503 = vmatprep.subr.bf16.mxu1 %v2083_v4  ;;  %1413 = vmatprep.subr.bf16.mxu0 %v2083_v4  ;;  %v1819_v27 = vpack.c.bf16 %v259_v20, %v252_v19  ;;  %v280_v50 = vand.u32 4294901760, %v279_v44  ;;  %v293_v1 = vsub.f32 %v1716_v41, %v292_v53  ;;  %v306_v8 = vand.u32 4294901760, %v1720_v43 }
  0x16   :  { %v1827_v39 = vpack.c.bf16 %v273_v36, %v266_v35  ;;  %v287_v52 = vand.u32 4294901760, %v286_v45  ;;  %v1837_v0 = vpack.c.bf16 %v299_v62, %v292_v53  ;;  %v300_v5 = vsub.f32 %v1718_v42, %v299_v62 }
  0x17   :  { %v294_v6 = vand.u32 4294901760, %v293_v1  ;;  %v313_v14 = vand.u32 4294901760, %v1727_v47  ;;  %v307_v18 = vsub.f32 %v1720_v43, %v306_v8  ;;  %v320_v26 = vand.u32 4294901760, %v1729_v48 }
  0x18   :  { %1505 = vmatpush1.bf16.msra.mxu1 %v1753_v58  ;;  %1415 = vmatpush1.bf16.msra.mxu0 %v1753_v58  ;;  %v1835_v63 = vpack.c.bf16 %v287_v52, %v280_v50  ;;  %v301_v7 = vand.u32 4294901760, %v300_v5  ;;  %v327_v33 = vand.u32 4294901760, %v1733_v49  ;;  %v334_v45 = vand.u32 4294901760, %v1735_v51 }
  0x19   :  { %1506 = vmatprep.subr.bf16.mxu1 %v2083_v4  ;;  %1416 = vmatprep.subr.bf16.mxu0 %v2083_v4  ;;  %v1845_v17 = vpack.c.bf16 %v313_v14, %v306_v8  ;;  %v314_v19 = vsub.f32 %v1727_v47, %v313_v14  ;;  %v308_v20 = vand.u32 4294901760, %v307_v18  ;;  %v321_v36 = vsub.f32 %v1729_v48, %v320_v26 }
  0x1a   :  { %v1843_v15 = vpack.c.bf16 %v301_v7, %v294_v6  ;;  %v1853_v35 = vpack.c.bf16 %v327_v33, %v320_v26  ;;  %v328_v37 = vsub.f32 %v1733_v49, %v327_v33  ;;  %v341_v50 = vand.u32 4294901760, %v1739_v54 }
  0x1b   :  { %v315_v25 = vand.u32 4294901760, %v314_v19  ;;  %v322_v38 = vand.u32 4294901760, %v321_v36  ;;  %v335_v62 = vsub.f32 %v1735_v51, %v334_v45  ;;  %v348_v7 = vand.u32 4294901760, %v1741_v55 }
  0x1c   :  { %1508 = vmatpush1.bf16.msra.mxu1 %v1759_v59  ;;  %1418 = vmatpush1.bf16.msra.mxu0 %v1759_v59  ;;  %v329_v44 = vand.u32 4294901760, %v328_v37  ;;  %v1861_v53 = vpack.c.bf16 %v341_v50, %v334_v45  ;;  %v342_v1 = vsub.f32 %v1739_v54, %v341_v50  ;;  %v355_v8 = vand.u32 4294901760, %v1743_v56 }
  0x1d   :  { %1509 = vmatprep.subr.bf16.mxu1 %v2083_v4  ;;  %1419 = vmatprep.subr.bf16.mxu0 %v2083_v4  ;;  %v1851_v34 = vpack.c.bf16 %v315_v25, %v308_v20  ;;  %v336_v5 = vand.u32 4294901760, %v335_v62  ;;  %v349_v19 = vsub.f32 %v1741_v55, %v348_v7  ;;  %v362_v33 = vand.u32 4294901760, %v1799_v10 }
  0x1e   :  { %v1859_v52 = vpack.c.bf16 %v329_v44, %v322_v38  ;;  %v343_v6 = vand.u32 4294901760, %v342_v1  ;;  %v1869_v18 = vpack.c.bf16 %v355_v8, %v348_v7  ;;  %v356_v20 = vsub.f32 %v1743_v56, %v355_v8 }
  0x1f   :  { %v350_v25 = vand.u32 4294901760, %v349_v19  ;;  %v369_v36 = vand.u32 4294901760, %v1801_v11  ;;  %v363_v44 = vsub.f32 %v1799_v10, %v362_v33  ;;  %v376_v1 = vand.u32 4294901760, %v1803_v12 }
  0x20   :  { %1511 = vmatpush1.bf16.msra.mxu1 %v1765_v60  ;;  %1421 = vmatpush1.bf16.msra.mxu0 %v1765_v60  ;;  %v1867_v14 = vpack.c.bf16 %v343_v6, %v336_v5  ;;  %v357_v26 = vand.u32 4294901760, %v356_v20  ;;  %v383_v5 = vand.u32 4294901760, %v1805_v13 }
  0x21   :  { %1512 = vmatprep.subr.bf16.mxu1 %v2083_v4  ;;  %1422 = vmatprep.subr.bf16.mxu0 %v2083_v4  ;;  %v1877_v38 = vpack.c.bf16 %v369_v36, %v362_v33  ;;  %v370_v45 = vsub.f32 %v1801_v11, %v369_v36  ;;  %v364_v50 = vand.u32 4294901760, %v363_v44  ;;  %v377_v8 = vsub.f32 %v1803_v12, %v376_v1 }
  0x22   :  { %v1875_v37 = vpack.c.bf16 %v357_v26, %v350_v25  ;;  %v1885_v7 = vpack.c.bf16 %v383_v5, %v376_v1  ;;  %v384_v19 = vsub.f32 %v1805_v13, %v383_v5 }
  0x23   :  { %v371_v62 = vand.u32 4294901760, %v370_v45  ;;  %v378_v20 = vand.u32 4294901760, %v377_v8 }
  0x24   :  { %1514 = vmatpush1.bf16.msra.mxu1 %v1771_v61  ;;  %1424 = vmatpush1.bf16.msra.mxu0 %v1771_v61  ;;  %v385_v25 = vand.u32 4294901760, %v384_v19 }
  0x25   :  { %1515 = vmatprep.subr.bf16.mxu1 %v2083_v4  ;;  %1425 = vmatprep.subr.bf16.mxu0 %v2083_v4  ;;  %v1883_v6 = vpack.c.bf16 %v371_v62, %v364_v50  ;;  %v1346_v50 = vld [vmem:[%s2077_s2 + $0x10] ss:$8 sm:$0x3] }
  0x26   :  { %v1889_v26 = vpack.c.bf16 %v385_v25, %v378_v20  ;;  %v102_v20 = vlaneseq }
  0x28   :  { %1517 = vmatpush1.bf16.msra.mxu1 %v1785_v3  ;;  %1427 = vmatpush1.bf16.msra.mxu0 %v1785_v3  ;;  %v103_v25 = vshrl.u32 %v102_v20, 7 }
  0x29   :  { %1518 = vmatprep.subr.bf16.mxu1 %v2083_v4  ;;  %1428 = vmatprep.subr.bf16.mxu0 %v2083_v4 }
  0x2a   :  { %v104_v45 = vsub.s32 0, %v103_v25  ;;  %v108_v62 = vsub.s32 1, %v103_v25 }
  0x2c   :  { %1520 = vmatpush1.bf16.msra.mxu1 %v1797_v9  ;;  %1430 = vmatpush1.bf16.msra.mxu0 %v1797_v9  ;;  %v1914_v44 = vrot.slane %v1346_v50, %v104_v45  ;;  %v109_v1 = vrot.slane %v1346_v50, %v108_v62 }
  0x2d   :  { %1521 = vmatprep.subr.bf16.mxu1 %v2083_v4  ;;  %1431 = vmatprep.subr.bf16.mxu0 %v2083_v4 }
  0xd8   :  { %v1916_v36 = vpop.f32.mrb[0].mxu0 }
  0xd9   :  { %vm112_vm1 = vcmp.eq.f32.partialorder %v1916_v36, %v1914_v44  ;;  %v98_v8 = vpop.f32.mrb[1].mxu0 }
  0xda   :  { %v1348_v20 = vsel %vm112_vm1, 1.0, %v1601_v2  ;;  %vm113_vm3 = vcmp.eq.f32.partialorder %v98_v8, %v109_v1 }
  0xdb   :  { %v1924_v19 = vsub.f32 %v1348_v20, %v1348_v20  ;;  %v1349_v25 = vsel %vm113_vm3, 1.0, %v1601_v2  ;;  %v2085_v20 = vmov 0.0|0.0  }
  0xdc   :  { %v145_v45 = vsel %vm143_vm2, %v1349_v25, 0 }
  0xdd   :  { %v232_v50 = vsub.f32 %v145_v45, %v145_v45  ;;  %v239_v62 = vand.u32 4294901760, %v1924_v19 }
  0xdf   :  { %v233_v5 = vand.u32 4294901760, %v232_v50  ;;  %v240_v33 = vsub.f32 %v1924_v19, %v239_v62 }
  0xe1   :  { %v234_v4 = vsub.f32 %v232_v50, %v233_v5  ;;  %620 = vmatprep.mubr.f32.mxu1 %v233_v5  ;;  %v241_v8 = vand.u32 4294901760, %v240_v33 }
  0xe2   :  { %624 = vmatmul.mubr.f32.vlgmr.msra.gmra.mrb[0].mxu1 %v239_v62  ;;  %v1358_v62 = vld [vmem:[%s2080_s4 + $0x7] ss:$0 sm:$0xff] }
  0xe3   :  { %1523 = vmatpush1.bf16.msra.mxu1 %v1813_v16  ;;  %1353 = vmatprep.mubr.msk.f32.mxu1 %vm143_vm2, %v1349_v25  ;;  %v235_v1 = vand.u32 4294901760, %v234_v4  ;;  %v1603_v4 = vmov 1.0   ;;  %v2086_v16 = vpack.c.bf16 %v1682_v23, %v1680_v22  ;;  %v2088_v22 = vpack.c.bf16 %v1706_v32, %v1699_v30 }
  0xe4   :  { %1524 = vmatprep.subr.bf16.mxu1 %v2085_v20  ;;  %v2089_v23 = vpack.c.bf16 %v1718_v42, %v1716_v41  ;;  %v2093_v30 = vpack.c.bf16 %v1743_v56, %v1741_v55  ;;  %v2094_v32 = vpack.c.bf16 %v1801_v11, %v1799_v10  ;;  %v2095_v41 = vpack.c.bf16 %v1805_v13, %v1803_v12  ;;  %v867_v55 = vld [vmem:[%s2080_s4] sm:$0x3f] }
  0xe5   :  { %236 = vmatprep.mubr.f32.mxu0 %v235_v1  ;;  %v887_v56 = vsel %vm885_vm4, %v867_v55, 0 }
  0xe6   :  { %242 = vmatmul.mubr.f32.vlgmr.msra.gmra.mrb[2].mxu0 %v241_v8 }
  0xe7   :  { %1433 = vmatpush1.bf16.msra.mxu0 %v1819_v27  ;;  %1526 = vmatpush1.bf16.msra.mxu1 %v1821_v31 }
  0xe8   :  { %1351 = vmatprep.mubr.msk.f32.mxu0 %vm143_vm2, %v1349_v25  ;;  %1434 = vmatprep.subr.bf16.mxu0 %v2085_v20 }
  0xe9   :  { %1527 = vmatprep.subr.bf16.mxu1 %v2085_v20 }
  0xeb   :  { %1436 = vmatpush1.bf16.msra.mxu0 %v1827_v39  ;;  %1529 = vmatpush1.bf16.msra.mxu1 %v1829_v40 }
  0xec   :  { %1437 = vmatprep.subr.bf16.mxu0 %v2085_v20  ;;  %1530 = vmatprep.subr.bf16.mxu1 %v2085_v20 }
  0xef   :  { %1439 = vmatpush1.bf16.msra.mxu0 %v1835_v63  ;;  %1532 = vmatpush1.bf16.msra.mxu1 %v1837_v0 }
  0xf0   :  { %1440 = vmatprep.subr.bf16.mxu0 %v2085_v20  ;;  %1533 = vmatprep.subr.bf16.mxu1 %v2085_v20 }
  0xf3   :  { %1442 = vmatpush1.bf16.msra.mxu0 %v1843_v15  ;;  %1535 = vmatpush1.bf16.msra.mxu1 %v1845_v17 }
  0xf4   :  { %1443 = vmatprep.subr.bf16.mxu0 %v2085_v20  ;;  %1536 = vmatprep.subr.bf16.mxu1 %v2085_v20 }
  0xf7   :  { %1445 = vmatpush1.bf16.msra.mxu0 %v1851_v34  ;;  %1538 = vmatpush1.bf16.msra.mxu1 %v1853_v35  ;;  %v1357_v35 = vld [vmem:[%s2080_s4 + $0x6] ss:$0 sm:$0xff] }
  0xf8   :  { %1446 = vmatprep.subr.bf16.mxu0 %v2085_v20  ;;  %1539 = vmatprep.subr.bf16.mxu1 %v2085_v20 }
  0xfb   :  { %1448 = vmatpush1.bf16.msra.mxu0 %v1859_v52  ;;  %1541 = vmatpush1.bf16.msra.mxu1 %v1861_v53 }
  0xfc   :  { %1449 = vmatprep.subr.bf16.mxu0 %v2085_v20  ;;  %1542 = vmatprep.subr.bf16.mxu1 %v2085_v20 }
  0xff   :  { %1451 = vmatpush1.bf16.msra.mxu0 %v1867_v14  ;;  %1544 = vmatpush1.bf16.msra.mxu1 %v1869_v18 }
 0x100   :  { %1452 = vmatprep.subr.bf16.mxu0 %v2085_v20  ;;  %1545 = vmatprep.subr.bf16.mxu1 %v2085_v20 }
 0x103   :  { %1454 = vmatpush1.bf16.msra.mxu0 %v1875_v37  ;;  %1547 = vmatpush1.bf16.msra.mxu1 %v1877_v38 }
 0x104   :  { %1455 = vmatprep.subr.bf16.mxu0 %v2085_v20  ;;  %1548 = vmatprep.subr.bf16.mxu1 %v2085_v20 }
 0x107   :  { %1457 = vmatpush1.bf16.msra.mxu0 %v1883_v6  ;;  %1550 = vmatpush1.bf16.msra.mxu1 %v1885_v7 }
 0x108   :  { %1458 = vmatprep.subr.bf16.mxu0 %v2085_v20  ;;  %1551 = vmatprep.subr.bf16.mxu1 %v2085_v20 }
 0x10a   :  { %1354 = vmatmul.mubr.msk.f32.vlgmr.msra.gmra.mrb[0].mxu1 %vm112_vm1, %v1603_v4 }
 0x10b   :  { %1460 = vmatpush1.bf16.msra.mxu0 %v1889_v26  ;;  %1553 = vmatpush1.bf16.msra.mxu1 %v1678_v21  ;;  %v2087_v21 = vpack.c.bf16 %v1697_v29, %v1684_v24  ;;  %v2090_v24 = vpack.c.bf16 %v1727_v47, %v1720_v43  ;;  %v2092_v29 = vpack.c.bf16 %v1739_v54, %v1735_v51 }
 0x10c   :  { %1355 = vmatprep.mubr.msk.f32.mxu1 %vm143_vm2, %v1349_v25  ;;  %1461 = vmatprep.subr.bf16.mxu0 %v2085_v20 }
 0x10d   :  { %1554 = vmatprep.subr.bf16.mxu1 %v2085_v20 }
 0x10e   :  { %1352 = vmatmul.mubr.msk.f32.vlgmr.msra.gmra.mrb[2].mxu0 %vm112_vm1, %v1603_v4 }
 0x10f   :  { %1463 = vmatpush1.bf16.msra.mxu0 %v2086_v16  ;;  %525 = vmatprep.mubr.f32.mxu0 %v232_v50 }
 0x110   :  { %1556 = vmatpush1.bf16.msra.mxu1 %v1695_v28  ;;  %1464 = vmatprep.subr.bf16.mxu0 %v2085_v20  ;;  %v2091_v28 = vpack.c.bf16 %v1733_v49, %v1729_v48 }
 0x111   :  { %1557 = vmatprep.subr.bf16.mxu1 %v2085_v20 }
 0x113   :  { %1466 = vmatpush1.bf16.msra.mxu0 %v2087_v21 }
 0x114   :  { %1559 = vmatpush1.bf16.msra.mxu1 %v1725_v46  ;;  %1467 = vmatprep.subr.bf16.mxu0 %v2085_v20  ;;  %v1350_v46 = vld [vmem:[%s2079_s3 + $0xa0] ss:$0 sm:$0xff]  ;;  %s1606_s3 = smov 122  }
 0x115   :  { %1560 = vmatprep.subr.bf16.mxu1 %v2085_v20 }
 0x117   :  { %1469 = vmatpush1.bf16.msra.mxu0 %v2088_v22 }
 0x118   :  { %1562 = vmatpush1.bf16.msra.mxu1 %v1747_v57  ;;  %1470 = vmatprep.subr.bf16.mxu0 %v2085_v20  ;;  %v890_v57 = vand.u32 4294901760, %v887_v56 }
 0x119   :  { %1563 = vmatprep.subr.bf16.mxu1 %v2085_v20 }
 0x11a   :  { %v967_v10 = vsub.f32 %v887_v56, %v890_v57 }
 0x11b   :  { %1472 = vmatpush1.bf16.msra.mxu0 %v2089_v23 }
 0x11c   :  { %1565 = vmatpush1.bf16.msra.mxu1 %v1753_v58  ;;  %1473 = vmatprep.subr.bf16.mxu0 %v2085_v20  ;;  %v1608_v58 = vmov 0   ;;  %v968_v27 = vand.u32 4294901760, %v967_v10 }
 0x11d   :  { %1566 = vmatprep.subr.bf16.mxu1 %v2085_v20  ;;  %1599 = vset.pattern.permute.xlu1 %v1608_v58 }
 0x11e   :  { %1600 = vset.pattern.permute.xlu0 %v1608_v58  ;;  %v969_v40 = vsub.f32 %v967_v10, %v968_v27 }
 0x11f   :  { %1475 = vmatpush1.bf16.msra.mxu0 %v2090_v24 }
 0x120   :  { %1568 = vmatpush1.bf16.msra.mxu1 %v1759_v59  ;;  %1476 = vmatprep.subr.bf16.mxu0 %v2085_v20  ;;  %v870_v59 = vld [vmem:[%s2081_s1] sm:$0xff]  ;;  %v970_v15 = vand.u32 4294901760, %v969_v40 }
 0x121   :  { %1569 = vmatprep.subr.bf16.mxu1 %v2085_v20 }
 0x123   :  { %1478 = vmatpush1.bf16.msra.mxu0 %v2091_v28 }
 0x124   :  { %1571 = vmatpush1.bf16.msra.mxu1 %v1765_v60  ;;  %1479 = vmatprep.subr.bf16.mxu0 %v2085_v20 }
 0x125   :  { %1572 = vmatprep.subr.bf16.mxu1 %v2085_v20 }
 0x127   :  { %1481 = vmatpush1.bf16.msra.mxu0 %v2092_v29 }
 0x128   :  { %1574 = vmatpush1.bf16.msra.mxu1 %v1771_v61  ;;  %1482 = vmatprep.subr.bf16.mxu0 %v2085_v20 }
 0x129   :  { %1575 = vmatprep.subr.bf16.mxu1 %v2085_v20 }
 0x12b   :  { %1484 = vmatpush1.bf16.msra.mxu0 %v2093_v30 }
 0x12c   :  { %1577 = vmatpush1.bf16.msra.mxu1 %v1785_v3  ;;  %1485 = vmatprep.subr.bf16.mxu0 %v2085_v20 }
 0x12d   :  { %1578 = vmatprep.subr.bf16.mxu1 %v2085_v20 }
 0x12f   :  { %1487 = vmatpush1.bf16.msra.mxu0 %v2094_v32 }
 0x130   :  { %1580 = vmatpush1.bf16.msra.mxu1 %v1797_v9  ;;  %1488 = vmatprep.subr.bf16.mxu0 %v2085_v20 }
 0x131   :  { %1371 = vmatprep.subr.mxu1 %v1601_v2 }
 0x133   :  { %1356 = vmatmul.mubr.msk.f32.vlgmr.msra.gmra.mrb[0].mxu1 %vm112_vm1, %v1603_v4  ;;  %1490 = vmatpush1.bf16.msra.mxu0 %v2095_v41 }
 0x134   :  { %1386 = vmatprep.subr.mxu0 %v1601_v2  ;;  %1373 = vmatprep.mubr.msk.f32.mxu1 %vm1604_vm5, %v1601_v2 }
 0x135   :  { %1372 = vmatpush3.msra.mxu1 %v890_v57 }
 0x136   :  { %528 = vmatmul.mubr.f32.vlgmr.msra.gmra.mrb[2].mxu0 %v1924_v19  ;;  %1376 = vmatprep.subr.mxu1 %v1601_v2 }
 0x137   :  { %1388 = vmatprep.mubr.msk.f32.mxu0 %vm1604_vm5, %v1601_v2  ;;  %1387 = vmatpush3.msra.mxu0 %v890_v57 }
 0x138   :  { %1391 = vmatprep.subr.mxu0 %v1601_v2 }
 0x206   :  { %v849_v42 = vpop.f32.mrb[0].mxu1 }
 0x207   :  { %v851_v43 = vpop.f32.mrb[1].mxu1 }
 0x209   :  { %v529_v47 = vpop.f32.mrb[2].mxu0 }
 0x20a   :  { %v1581_v48 = vadd.f32 %v1350_v46, %v529_v47  ;;  %v531_v49 = vpop.f32.mrb[3].mxu0 }
 0x20c   :  { %v1582_v51 = vadd.f32 %v1581_v48, %v849_v42 }
 0x20e   :  { %v853_v54 = vmax.f32 %v1582_v51, 0.0 }
 0x210   :  { %863 = vrot.lane.b32.xlu1 %v853_v54, %s1605_s17  ;;  %855 = vrot.lane.b32.xlu0 %v853_v54, %s1606_s3 }
 0x214   :  { %859 = vrot.lane.b32.xlu0 %v853_v54, %s1607_s18  ;;  %873 = vperm.xlu1 %1599, %v870_v59  }
 0x282   :  { %v856_v60 = vpop.permute.xlu0 %855  ;;  %v864_v11 = vpop.permute.xlu1 %863 }
 0x283   :  { %v858_v61 = vmax.f32 %v853_v54, %v856_v60 }
 0x286   :  { %v860_v3 = vpop.permute.xlu0 %859 }
 0x287   :  { %v862_v9 = vmax.f32 %v858_v61, %v860_v3 }
 0x289   :  { %v866_v12 = vmax.f32 %v862_v9, %v864_v11 }
 0x28b   :  { %v883_v13 = vsel %vm881_vm6, %v866_v12, 0 }
 0x28c   :  { %v955_v31 = vand.u32 4294901760, %v883_v13 }
 0x28e   :  { %v956_v39 = vsub.f32 %v883_v13, %v955_v31 }
 0x290   :  { %v957_v63 = vand.u32 4294901760, %v956_v39 }
 0x292   :  { %1389 = vmatmul.mubr.f32.vlgmr.msra.gmra.mrb[4].mxu0 %v957_v63  ;;  %v958_v0 = vsub.f32 %v956_v39, %v957_v63 }
 0x293   :  { %1392 = vmatpush3.msra.mxu0 %v968_v27  ;;  %1393 = vmatprep.mubr.msk.f32.mxu0 %vm1604_vm5, %v1601_v2  ;;  %v874_v52 = vpop.permute.xlu1 %873 }
 0x294   :  { %v959_v17 = vand.u32 4294901760, %v958_v0  ;;  %1396 = vmatprep.subr.mxu0 %v1601_v2  ;;  %v880_v14 = vmul.f32 %v1357_v35, %v874_v52 }
 0x296   :  { %1374 = vmatmul.mubr.f32.vlgmr.msra.gmra.mrb[2].mxu1 %v959_v17  ;;  %1394 = vmatmul.mubr.f32.vlgmr.msra.gmra.mrb[6].mxu0 %v955_v31 }
 0x297   :  { %1377 = vmatpush3.msra.mxu1 %v970_v15  ;;  %1378 = vmatprep.mubr.msk.f32.mxu1 %vm1604_vm5, %v1601_v2 }
 0x298   :  { %1381 = vmatprep.subr.mxu1 %v1601_v2  ;;  %1397 = vmatpush3.msra.mxu0 %v890_v57 }
 0x299   :  { %1398 = vmatprep.mubr.msk.f32.mxu0 %vm1604_vm5, %v1601_v2 }
 0x29a   :  { %1379 = vmatmul.mubr.f32.vlgmr.msra.gmra.mrb[4].mxu1 %v955_v31  ;;  %1399 = vmatmul.mubr.f32.vlgmr.msra.gmra.mrb[8].mxu0 %v955_v31 }
 0x29b   :  { %1382 = vmatpush3.msra.mxu1 %v967_v10  ;;  %1383 = vmatprep.mubr.msk.f32.mxu1 %vm1604_vm5, %v1601_v2 }
 0x29e   :  { %1384 = vmatmul.mubr.f32.vlgmr.msra.gmra.mrb[6].mxu1 %v956_v39 }
 0x365   :  { %v1185_v34 = vpop.f32.mrb[4].mxu0 }
 0x366   :  { %v1390_v53 = vpop.f32.mrb[5].mxu0 }
 0x369   :  { %v961_v18 = vpop.f32.mrb[2].mxu1  ;;  %v1259_v37 = vpop.f32.mrb[6].mxu0 }
 0x36a   :  { %v1375_v38 = vpop.f32.mrb[3].mxu1  ;;  %v1395_v6 = vpop.f32.mrb[7].mxu0  ;;  %v962_v7 = vadd.f32 %v961_v18, %v880_v14 }
 0x36d   :  { %v1037_v26 = vpop.f32.mrb[4].mxu1  ;;  %v1331_v33 = vpop.f32.mrb[8].mxu0 }
 0x36e   :  { %v1038_v36 = vadd.f32 %v1037_v26, %v962_v7  ;;  %v1380_v44 = vpop.f32.mrb[5].mxu1  ;;  %v1400_v5 = vpop.f32.mrb[9].mxu0 }
 0x371   :  { %v1111_v2 = vpop.f32.mrb[6].mxu1 }
 0x372   :  { %v1112_v19 = vadd.f32 %v1111_v2, %v1038_v36  ;;  %v1385_v25 = vpop.f32.mrb[7].mxu1 }
 0x374   :  { %v1186_v45 = vadd.f32 %v1185_v34, %v1112_v19 }
 0x376   :  { %v1260_v50 = vadd.f32 %v1259_v37, %v1186_v45 }
 0x378   :  { %v1332_v1 = vadd.f32 %v1331_v33, %v1260_v50 }
 0x37a   :  { %v1339_v8 = vadd.f32 %v1358_v62, %v1332_v1 }
 0x37c   :  { %1341 = vst.msk [vmem:[%s2082_s5] sm:$0xff] %vm1340_vm7, %v1339_v8 }

</bundles_post_ra>
